<compile_context>
chip_gen: v7x
topology: tpu7x:2x2x1
jax: 0.10.0
libtpu: 0.0.40
codegen_flags: <defaults>
</compile_context>

<pallas_src>
import functools

import jax
import jax.numpy as jnp
from jax.experimental import pallas as pl
from jax.experimental.pallas import tpu as pltpu

_F_NORMALIZE_EPS_SQ = 1e-24   # (torch F.normalize eps = 1e-12)^2, clamp on sum-of-squares
_PAIRWISE_EPS = 1e-6          # torch F.pairwise_distance default eps (added to the difference)
_CHUNK_D = 512                # feature columns consumed per inner step (bounds f32 working set)


def _pairwise_dist_sq_kernel(s_ref, t_ref, d2_ref, *, batch, tile_b, feat_d):
    chunk = min(_CHUNK_D, feat_d)
    n_full = feat_d // chunk
    rem = feat_d - n_full * chunk

    def accumulate(s_chunk, t_chunk, carry):
        ss, tt, st, s_sum, t_sum = carry
        sf = s_chunk.astype(jnp.float32)
        tf = t_chunk.astype(jnp.float32)
        ss = ss + jnp.sum(sf * sf, axis=1, keepdims=True)
        tt = tt + jnp.sum(tf * tf, axis=1, keepdims=True)
        st = st + jnp.sum(sf * tf, axis=1, keepdims=True)
        s_sum = s_sum + jnp.sum(sf, axis=1, keepdims=True)
        t_sum = t_sum + jnp.sum(tf, axis=1, keepdims=True)
        return ss, tt, st, s_sum, t_sum

    zero = jnp.zeros((tile_b, 1), jnp.float32)
    carry = (zero, zero, zero, zero, zero)

    def body(c, carry):
        off = pl.multiple_of(c * chunk, chunk)
        return accumulate(s_ref[:, pl.ds(off, chunk)],
                          t_ref[:, pl.ds(off, chunk)], carry)

    carry = jax.lax.fori_loop(0, n_full, body, carry, unroll=(n_full <= 8))
    if rem > 0:  # static tail when feat_d is not a multiple of the chunk width
        carry = accumulate(s_ref[:, pl.ds(n_full * chunk, rem)],
                           t_ref[:, pl.ds(n_full * chunk, rem)], carry)

    ss, tt, st, s_sum, t_sum = carry
    inv_s = jax.lax.rsqrt(jnp.maximum(ss, _F_NORMALIZE_EPS_SQ))
    inv_t = jax.lax.rsqrt(jnp.maximum(tt, _F_NORMALIZE_EPS_SQ))
    d2 = (ss * inv_s * inv_s
          + tt * inv_t * inv_t
          - 2.0 * (inv_s * inv_t) * st
          + (2.0 * _PAIRWISE_EPS) * (inv_s * s_sum - inv_t * t_sum)
          + float(feat_d) * _PAIRWISE_EPS * _PAIRWISE_EPS)

    # Rows past the true batch (partial last block) may contain garbage: zero them.
    i = pl.program_id(0)
    row = i * tile_b + jax.lax.broadcasted_iota(jnp.int32, (tile_b, 1), 0)
    d2_ref[...] = jnp.where(row < batch, d2, 0.0)


def _choose_tile_b(B, D, itemsize):
    if B <= 8:
        return B  # single exact block; nothing to pipeline or shard at this size
    # Double-buffered s + t feature blocks are the only large VMEM consumers now
    # that the f32 work is streamed in _CHUNK_D-wide slices.
    db_bytes_per_row = 2 * 2 * D * itemsize
    vmem_rows = max(8, (24 * 1024 * 1024) // db_bytes_per_row)   # headroom inside 32 MiB
    tile = min(512, vmem_rows)
    # v7x megacore: keep at least ~4 grid steps so "parallel" can shard across
    # both TensorCores (costs nothing on single-core v5e/v6e).
    tile = min(tile, max(8, pl.cdiv(B, 4)))
    return max(8, (tile // 8) * 8)


def contrastive_loss(source_features, target_features, labels, margin=1.0):
    """source/target: (B, C, H, W) arrays (any float dtype), labels: (B,) {0,1}."""
    B = source_features.shape[0]
    s_flat = source_features.reshape(B, -1)   # keep original dtype (bf16 stays bf16)
    t_flat = target_features.reshape(B, -1)
    D = s_flat.shape[1]

    itemsize = jnp.dtype(s_flat.dtype).itemsize
    tile_b = _choose_tile_b(B, D, itemsize)
    num_tiles = pl.cdiv(B, tile_b)
    b_pad = num_tiles * tile_b   # only the tiny output is over-allocated; features are NOT padded

    kernel = functools.partial(
        _pairwise_dist_sq_kernel, batch=B, tile_b=tile_b, feat_d=D)

    d2 = pl.pallas_call(
        kernel,
        out_shape=jax.ShapeDtypeStruct((b_pad, 1), jnp.float32),
        grid=(num_tiles,),
        in_specs=[
            pl.BlockSpec((tile_b, D), lambda i: (i, 0)),
            pl.BlockSpec((tile_b, D), lambda i: (i, 0)),
        ],
        out_specs=pl.BlockSpec((tile_b, 1), lambda i: (i, 0)),
        compiler_params=pltpu.CompilerParams(
            dimension_semantics=("parallel",),
            vmem_limit_bytes=32 * 1024 * 1024,
        ),
    )(s_flat, t_flat)

    # Tiny per-row epilogue (B elements) in plain XLA: labels never enter the kernel.
    d2 = d2[:B, 0]
    d = jnp.sqrt(d2)
    lab = labels.astype(jnp.float32)
    hinge = jnp.maximum(float(margin) - d, 0.0)
    loss = 0.5 * (lab * d2 + (1.0 - lab) * hinge * hinge)
    return jnp.mean(loss)


def _reference(source_features, target_features, labels, margin=1.0):
    B = source_features.shape[0]
    s = source_features.reshape(B, -1).astype(jnp.float32)
    t = target_features.reshape(B, -1).astype(jnp.float32)
    s = s / jnp.maximum(jnp.linalg.norm(s, axis=1, keepdims=True), 1e-12)
    t = t / jnp.maximum(jnp.linalg.norm(t, axis=1, keepdims=True), 1e-12)
    d = jnp.sqrt(jnp.sum((s - t + _PAIRWISE_EPS) ** 2, axis=1))
    lab = labels.astype(jnp.float32)
    loss = 0.5 * (lab * d ** 2 + (1 - lab) * jnp.maximum(margin - d, 0.0) ** 2)
    return jnp.mean(loss)


if __name__ == "__main__":
    key = jax.random.PRNGKey(0)

    cases = [
        dict(shape=(2, 4, 16, 16), dtype=jnp.float32),     # B=2,  D=1024, single exact block
        dict(shape=(32, 5, 12, 12), dtype=jnp.bfloat16),   # B=32, D=720, 4 grid steps + tail chunk
    ]
    for cfg in cases:
        key, k1, k2, k3 = jax.random.split(key, 4)
        src = jax.random.normal(k1, cfg["shape"], dtype=cfg["dtype"])
        tgt = jax.random.normal(k2, cfg["shape"], dtype=cfg["dtype"])
        lab = jax.random.bernoulli(k3, 0.5, (cfg["shape"][0],)).astype(jnp.int32)

        out = jax.block_until_ready(contrastive_loss(src, tgt, lab, margin=1.0))
        ref = _reference(src, tgt, lab, margin=1.0)
        assert jnp.allclose(out, ref, atol=1e-4, rtol=1e-4), (cfg, out, ref)

    print("KERNEL_OK")
</pallas_src>

<mosaic_0001>
module attributes {stable_mosaic.version = 11 : i64} {
  func.func @_pairwise_dist_sq_kernel(%arg0: i32, %arg1: memref<2x1024xf32, #tpu.memory_space<vmem>>, %arg2: memref<2x1024xf32, #tpu.memory_space<vmem>>, %arg3: memref<2x1xf32, #tpu.memory_space<vmem>>) attributes {dimension_semantics = [#tpu.dimension_semantics<parallel>], iteration_bounds = array<i64: 1>, scalar_prefetch = 0 : i64, scratch_operands = 0 : i64, tpu.core_type = #tpu.core_type<tc>, window_params = [{transform_indices = @transform_0, window_bounds = array<i64: 2, 1024>}, {transform_indices = @transform_1, window_bounds = array<i64: 2, 1024>}, {transform_indices = @transform_2, window_bounds = array<i64: 2, 1>}]} {
    %cst = arith.constant 0.000000e+00 : f32
    %0 = vector.broadcast %cst : f32 to vector<2x1xf32>
    %c0_i32 = arith.constant 0 : i32
    %c512_i32 = arith.constant 512 : i32
    %1 = arith.muli %c0_i32, %c512_i32 : i32
    %2 = tpu.assume_multiple %1, 512 : i32
    %c0 = arith.constant 0 : index
    %3 = arith.index_cast %2 : i32 to index
    %4 = vector.load %arg1[%c0, %3] : memref<2x1024xf32, #tpu.memory_space<vmem>>, vector<2x512xf32>
    %c0_0 = arith.constant 0 : index
    %5 = arith.index_cast %2 : i32 to index
    %6 = vector.load %arg2[%c0_0, %5] : memref<2x1024xf32, #tpu.memory_space<vmem>>, vector<2x512xf32>
    %7 = arith.mulf %4, %4 : vector<2x512xf32>
    %cst_1 = arith.constant dense<0.000000e+00> : vector<2xf32>
    %8 = vector.multi_reduction <add>, %7, %cst_1 [1] : vector<2x512xf32> to vector<2xf32>
    %9 = vector.shape_cast %8 : vector<2xf32> to vector<2x1xf32>
    %10 = arith.addf %0, %9 : vector<2x1xf32>
    %11 = arith.mulf %6, %6 : vector<2x512xf32>
    %cst_2 = arith.constant dense<0.000000e+00> : vector<2xf32>
    %12 = vector.multi_reduction <add>, %11, %cst_2 [1] : vector<2x512xf32> to vector<2xf32>
    %13 = vector.shape_cast %12 : vector<2xf32> to vector<2x1xf32>
    %14 = arith.addf %0, %13 : vector<2x1xf32>
    %15 = arith.mulf %4, %6 : vector<2x512xf32>
    %cst_3 = arith.constant dense<0.000000e+00> : vector<2xf32>
    %16 = vector.multi_reduction <add>, %15, %cst_3 [1] : vector<2x512xf32> to vector<2xf32>
    %17 = vector.shape_cast %16 : vector<2xf32> to vector<2x1xf32>
    %18 = arith.addf %0, %17 : vector<2x1xf32>
    %cst_4 = arith.constant dense<0.000000e+00> : vector<2xf32>
    %19 = vector.multi_reduction <add>, %4, %cst_4 [1] : vector<2x512xf32> to vector<2xf32>
    %20 = vector.shape_cast %19 : vector<2xf32> to vector<2x1xf32>
    %21 = arith.addf %0, %20 : vector<2x1xf32>
    %cst_5 = arith.constant dense<0.000000e+00> : vector<2xf32>
    %22 = vector.multi_reduction <add>, %6, %cst_5 [1] : vector<2x512xf32> to vector<2xf32>
    %23 = vector.shape_cast %22 : vector<2xf32> to vector<2x1xf32>
    %24 = arith.addf %0, %23 : vector<2x1xf32>
    %c1_i32 = arith.constant 1 : i32
    %c512_i32_6 = arith.constant 512 : i32
    %25 = arith.muli %c1_i32, %c512_i32_6 : i32
    %26 = tpu.assume_multiple %25, 512 : i32
    %c0_7 = arith.constant 0 : index
    %27 = arith.index_cast %26 : i32 to index
    %28 = vector.load %arg1[%c0_7, %27] : memref<2x1024xf32, #tpu.memory_space<vmem>>, vector<2x512xf32>
    %c0_8 = arith.constant 0 : index
    %29 = arith.index_cast %26 : i32 to index
    %30 = vector.load %arg2[%c0_8, %29] : memref<2x1024xf32, #tpu.memory_space<vmem>>, vector<2x512xf32>
    %31 = arith.mulf %28, %28 : vector<2x512xf32>
    %cst_9 = arith.constant dense<0.000000e+00> : vector<2xf32>
    %32 = vector.multi_reduction <add>, %31, %cst_9 [1] : vector<2x512xf32> to vector<2xf32>
    %33 = vector.shape_cast %32 : vector<2xf32> to vector<2x1xf32>
    %34 = arith.addf %10, %33 : vector<2x1xf32>
    %35 = arith.mulf %30, %30 : vector<2x512xf32>
    %cst_10 = arith.constant dense<0.000000e+00> : vector<2xf32>
    %36 = vector.multi_reduction <add>, %35, %cst_10 [1] : vector<2x512xf32> to vector<2xf32>
    %37 = vector.shape_cast %36 : vector<2xf32> to vector<2x1xf32>
    %38 = arith.addf %14, %37 : vector<2x1xf32>
    %39 = arith.mulf %28, %30 : vector<2x512xf32>
    %cst_11 = arith.constant dense<0.000000e+00> : vector<2xf32>
    %40 = vector.multi_reduction <add>, %39, %cst_11 [1] : vector<2x512xf32> to vector<2xf32>
    %41 = vector.shape_cast %40 : vector<2xf32> to vector<2x1xf32>
    %42 = arith.addf %18, %41 : vector<2x1xf32>
    %cst_12 = arith.constant dense<0.000000e+00> : vector<2xf32>
    %43 = vector.multi_reduction <add>, %28, %cst_12 [1] : vector<2x512xf32> to vector<2xf32>
    %44 = vector.shape_cast %43 : vector<2xf32> to vector<2x1xf32>
    %45 = arith.addf %21, %44 : vector<2x1xf32>
    %cst_13 = arith.constant dense<0.000000e+00> : vector<2xf32>
    %46 = vector.multi_reduction <add>, %30, %cst_13 [1] : vector<2x512xf32> to vector<2xf32>
    %47 = vector.shape_cast %46 : vector<2xf32> to vector<2x1xf32>
    %48 = arith.addf %24, %47 : vector<2x1xf32>
    %c2_i32 = arith.constant 2 : i32
    %cst_14 = arith.constant 1.000000e-24 : f32
    %49 = vector.broadcast %cst_14 : f32 to vector<2x1xf32>
    %50 = arith.maximumf %34, %49 : vector<2x1xf32>
    %51 = math.rsqrt %50 : vector<2x1xf32>
    %cst_15 = arith.constant 1.000000e-24 : f32
    %52 = vector.broadcast %cst_15 : f32 to vector<2x1xf32>
    %53 = arith.maximumf %38, %52 : vector<2x1xf32>
    %54 = math.rsqrt %53 : vector<2x1xf32>
    %55 = arith.mulf %34, %51 : vector<2x1xf32>
    %56 = arith.mulf %55, %51 : vector<2x1xf32>
    %57 = arith.mulf %38, %54 : vector<2x1xf32>
    %58 = arith.mulf %57, %54 : vector<2x1xf32>
    %59 = arith.addf %56, %58 : vector<2x1xf32>
    %60 = arith.mulf %51, %54 : vector<2x1xf32>
    %cst_16 = arith.constant 2.000000e+00 : f32
    %61 = vector.broadcast %cst_16 : f32 to vector<2x1xf32>
    %62 = arith.mulf %61, %60 : vector<2x1xf32>
    %63 = arith.mulf %62, %42 : vector<2x1xf32>
    %64 = arith.subf %59, %63 : vector<2x1xf32>
    %65 = arith.mulf %51, %45 : vector<2x1xf32>
    %66 = arith.mulf %54, %48 : vector<2x1xf32>
    %67 = arith.subf %65, %66 : vector<2x1xf32>
    %cst_17 = arith.constant 2.000000e-06 : f32
    %68 = vector.broadcast %cst_17 : f32 to vector<2x1xf32>
    %69 = arith.mulf %68, %67 : vector<2x1xf32>
    %70 = arith.addf %64, %69 : vector<2x1xf32>
    %cst_18 = arith.constant 1.024000e-09 : f32
    %71 = vector.broadcast %cst_18 : f32 to vector<2x1xf32>
    %72 = arith.addf %70, %71 : vector<2x1xf32>
    %c2_i32_19 = arith.constant 2 : i32
    %73 = arith.muli %arg0, %c2_i32_19 : i32
    %74 = tpu.iota {dimensions = array<i32: 0>} : vector<2x1xi32>
    %75 = vector.broadcast %73 : i32 to vector<2x1xi32>
    %76 = arith.addi %75, %74 : vector<2x1xi32>
    %c2_i32_20 = arith.constant 2 : i32
    %77 = vector.broadcast %c2_i32_20 : i32 to vector<2x1xi32>
    %78 = arith.cmpi slt, %76, %77 : vector<2x1xi32>
    %cst_21 = arith.constant 0.000000e+00 : f32
    %79 = vector.broadcast %cst_21 : f32 to vector<2x1xf32>
    %80 = arith.select %78, %72, %79 : vector<2x1xi1>, vector<2x1xf32>
    %c0_22 = arith.constant 0 : index
    %c0_23 = arith.constant 0 : index
    %81 = vector.load %arg3[%c0_22, %c0_23] : memref<2x1xf32, #tpu.memory_space<vmem>>, vector<2x1xf32>
    tpu.vector_store %arg3[%c0_22, %c0_23], %80 {strides = array<i32>} : memref<2x1xf32, #tpu.memory_space<vmem>>, vector<2x1xf32>,
    return
  }
  func.func @transform_0(%arg0: i32) -> (i32, i32) {
    %c0_i32 = arith.constant 0 : i32
    %c0_i32_0 = arith.constant 0 : i32
    return %arg0, %c0_i32 : i32, i32
  }
  func.func @transform_1(%arg0: i32) -> (i32, i32) {
    %c0_i32 = arith.constant 0 : i32
    %c0_i32_0 = arith.constant 0 : i32
    return %arg0, %c0_i32 : i32, i32
  }
  func.func @transform_2(%arg0: i32) -> (i32, i32) {
    %c0_i32 = arith.constant 0 : i32
    %c0_i32_0 = arith.constant 0 : i32
    return %arg0, %c0_i32 : i32, i32
  }
}

</mosaic_0001>

<bundles_post_ra>
// kernel: tpu_custom_call.1
= control target key start
LH: loop header
LB: loop body
LE: loop exit
PB: predicated region body
PF: predicated region fallthrough
CT: control target
= control target key end

     0   :  { %7 = vsyncpa [#allocation3], 0  ;;  %s609_s0 = inlined_call_operand.hbm [shape: f32[2,1024], index: 0, kind: input, shape index: {}]   ;;  %s610_s1 = inlined_call_operand.hbm [shape: f32[2,1024], index: 1, kind: input, shape index: {}]   ;;  %s611_s2 = inlined_call_operand.vmem [shape: f32[2,1], index: 2, kind: output, shape index: {}]  }
   0x1   :  { %8 = vsyncpa [#allocation5], 0  ;;  %s461_s9 = smov [#allocation2]   ;;  %s462_s11 = smov [#allocation4]  }
   0x2   :  { %s15_s10 = sshll.u32 %s461_s9, 4  ;;  %s25_s12 = sshll.u32 %s462_s11, 4  ;;  %s16_s10 = int_to_ptr.vmem [resolvable:$true] %s15_s10  ;;  %s26_s12 = int_to_ptr.vmem [resolvable:$true] %s25_s12 }
   0x3   :  { %s413_s15 = scalar_lea.hbm %s609_s0, 256 }
   0x4   :  { %p414_p0 = scmp.ne.s32.totalorder %s609_s0, %s413_s15  ;;  %p417_p1 = scmp.lt.u32.totalorder %s413_s15, %s609_s0 }
   0x6   :  { %p419_p2 = pnand %p417_p1, %p414_p0 }
   0x8   :  { %422 = shalt.err (!%p419_p2)
}
   0x9   :  { %s423_s20 = scalar_lea.vmem %s16_s10, 256  ;;  %p428_p4 = scmp.lt.s32.totalorder %s16_s10, %s16_s10 }
   0xa   :  { %p424_p3 = scmp.ne.s32.totalorder %s16_s10, %s423_s20  ;;  %p429_p5 = scmp.lt.s32.totalorder %s423_s20, %s423_s20 }
   0xc   :  { %p430_p6 = por %p429_p5, %p428_p4 }
   0xe   :  { %p431_p7 = pnand %p430_p6, %p424_p3 }
  0x10   :  { %434 = shalt.err (!%p431_p7)
}
  0x11   :  { %18 = dma.hbm_to_vmem [thread:$0]  %s609_s0, 256, %s16_s10, [#allocation3]  }
  0x12   :  { %s435_s25 = scalar_lea.hbm %s610_s1, 256 }
  0x13   :  { %p436_p8 = scmp.ne.s32.totalorder %s610_s1, %s435_s25  ;;  %p439_p9 = scmp.lt.u32.totalorder %s435_s25, %s610_s1 }
  0x15   :  { %p441_p10 = pnand %p439_p9, %p436_p8 }
  0x17   :  { %444 = shalt.err (!%p441_p10)
}
  0x18   :  { %s445_s30 = scalar_lea.vmem %s26_s12, 256  ;;  %p450_p12 = scmp.lt.s32.totalorder %s26_s12, %s26_s12 }
  0x19   :  { %p446_p11 = scmp.ne.s32.totalorder %s26_s12, %s445_s30  ;;  %p451_p13 = scmp.lt.s32.totalorder %s445_s30, %s445_s30 }
  0x1b   :  { %p452_p0 = por %p451_p13, %p450_p12 }
  0x1d   :  { %p453_p1 = pnand %p452_p0, %p446_p11 }
  0x1f   :  { %456 = shalt.err (!%p453_p1)
}
  0x20   :  { %28 = dma.hbm_to_vmem [thread:$0]  %s610_s1, 256, %s26_s12, [#allocation5]  }
  0x21   :  { %457 = dma.done.wait [#allocation3], 256  }
  0x22   :  { %458 = vsyncadd [#allocation3], 4294967040 }
  0x23   :  { %459 = dma.done.wait [#allocation5], 256  }
  0x24   :  { %460 = vsyncadd [#allocation5], 4294967040  ;;  %v43_v0 = vlaneseq  ;;  %v463_v1 = vmov 1983009808   ;;  %vm60_vm0 = vcmask 1041408   ;;  %v508_v6 = vld [vmem:[#allocation2 + $0x8] sm:$0xff] }
  0x25   :  { %v41_v2 = vunpack.c.l.s4 %v463_v1  ;;  %v510_v7 = vld [vmem:[#allocation2] sm:$0xff]  ;;  %v512_v8 = vld [vmem:[#allocation4 + $0x8] sm:$0xff]  ;;  %v205_v9 = vmul.f32 %v508_v6, %v508_v6  ;;  %v520_v12 = vld [vmem:[#allocation4] sm:$0xff]  ;;  %vm394_vm2 = vcmask 1024  }
  0x26   :  { %v503_v3 = vshrl.u32 %v43_v0, 7  ;;  %v37_v10 = vmul.f32 %v510_v7, %v510_v7  ;;  %v238_v11 = vmul.f32 %v512_v8, %v512_v8  ;;  %v138_v13 = vcombine.high %v510_v7, %v510_v7 }
  0x27   :  { %v42_v4 = vunpack.c.0.s8 %v41_v2  ;;  %v71_v14 = vmul.f32 %v520_v12, %v520_v12  ;;  %v170_v15 = vcombine.high %v520_v12, %v520_v12  ;;  %v207_v18 = vcombine.high %v205_v9, %v205_v9 }
  0x28   :  { %v39_v20 = vcombine.high %v37_v10, %v37_v10  ;;  %v240_v22 = vcombine.high %v238_v11, %v238_v11  ;;  %vm392_vm1 = vcmp.lt.s32.totalorder %v503_v3, 2 }
  0x29   :  { %v506_v5 = vsub.s32 %v42_v4, %v503_v3  ;;  %v73_v24 = vcombine.high %v71_v14, %v71_v14 }
  0x2b   :  { %v177_v16 = vrot.slane %v520_v12, %v506_v5  ;;  %v532_v17 = vrot.slane %v510_v7, %v506_v5  ;;  %v214_v19 = vrot.slane %v205_v9, %v506_v5  ;;  %v46_v21 = vrot.slane %v37_v10, %v506_v5 }
  0x2c   :  { %v247_v23 = vrot.slane %v238_v11, %v506_v5  ;;  %v80_v25 = vrot.slane %v71_v14, %v506_v5  ;;  %v221_v26 = vrot.slane %v207_v18, %v506_v5  ;;  %v53_v29 = vrot.slane %v39_v20, %v506_v5 }
  0x2d   :  { %v222_v27 = vcombine.high %v214_v19, %v214_v19  ;;  %v228_v28 = vsel %vm60_vm0, %v214_v19, 0.0  ;;  %v54_v30 = vcombine.high %v46_v21, %v46_v21  ;;  %v61_v31 = vsel %vm60_vm0, %v46_v21, 0.0 }
  0x2e   :  { %v254_v32 = vrot.slane %v240_v22, %v506_v5  ;;  %v255_v33 = vcombine.high %v247_v23, %v247_v23  ;;  %v223_v34 = vcombine.high %v221_v26, %v221_v26  ;;  %v231_v36 = vsel %vm60_vm0, %v221_v26, 0.0 }
  0x2f   :  { %v229_v35 = vsel %vm60_vm0, %v222_v27, 0.0  ;;  %v55_v37 = vcombine.high %v53_v29, %v53_v29  ;;  %v62_v39 = vsel %vm60_vm0, %v54_v30, 0.0  ;;  %v64_v40 = vsel %vm60_vm0, %v53_v29, 0.0 }
  0x30   :  { %v230_v38 = vadd.f32 %v229_v35, %v228_v28  ;;  %v256_v41 = vcombine.high %v254_v32, %v254_v32  ;;  %v233_v42 = vsel %vm60_vm0, %v223_v34, 0.0  ;;  %v63_v43 = vadd.f32 %v62_v39, %v61_v31 }
  0x31   :  { %v66_v44 = vsel %vm60_vm0, %v55_v37, 0.0  ;;  %v261_v45 = vsel %vm60_vm0, %v247_v23, 0.0  ;;  %v262_v47 = vsel %vm60_vm0, %v255_v33, 0.0  ;;  %v264_v48 = vsel %vm60_vm0, %v254_v32, 0.0 }
  0x32   :  { %v232_v46 = vadd.f32 %v231_v36, %v230_v38  ;;  %v266_v49 = vsel %vm60_vm0, %v256_v41, 0.0  ;;  %v65_v50 = vadd.f32 %v64_v40, %v63_v43  ;;  %v263_v51 = vadd.f32 %v262_v47, %v261_v45 }
  0x33   :  { %v87_v52 = vrot.slane %v73_v24, %v506_v5  ;;  %v88_v53 = vcombine.high %v80_v25, %v80_v25  ;;  %v94_v55 = vsel %vm60_vm0, %v80_v25, 0.0  ;;  %v184_v56 = vrot.slane %v170_v15, %v506_v5 }
  0x34   :  { %v234_v54 = vadd.f32 %v233_v42, %v232_v46  ;;  %v185_v57 = vcombine.high %v177_v16, %v177_v16  ;;  %v67_v58 = vadd.f32 %v66_v44, %v65_v50  ;;  %v265_v59 = vadd.f32 %v264_v48, %v263_v51 }
  0x35   :  { %v89_v60 = vcombine.high %v87_v52, %v87_v52  ;;  %v95_v61 = vsel %vm60_vm0, %v88_v53, 0.0  ;;  %v97_v63 = vsel %vm60_vm0, %v87_v52, 0.0  ;;  %v186_v0 = vcombine.high %v184_v56, %v184_v56 }
  0x36   :  { %235 = vadd.xlane.f32.xlu1 %v234_v54  ;;  %v96_v62 = vadd.f32 %v95_v61, %v94_v55  ;;  %v191_v1 = vsel %vm60_vm0, %v177_v16, 0.0  ;;  %68 = vadd.xlane.f32.xlu0 %v67_v58  ;;  %v267_v2 = vadd.f32 %v266_v49, %v265_v59  ;;  %v192_v9 = vsel %vm60_vm0, %v185_v57, 0.0 }
  0x37   :  { %v99_v4 = vsel %vm60_vm0, %v89_v60, 0.0  ;;  %v194_v10 = vsel %vm60_vm0, %v184_v56, 0.0  ;;  %v193_v14 = vadd.f32 %v192_v9, %v191_v1  ;;  %v196_v15 = vsel %vm60_vm0, %v186_v0, 0.0 }
  0x38   :  { %v98_v11 = vadd.f32 %v97_v63, %v96_v62  ;;  %v152_v18 = vrot.slane %v138_v13, %v506_v5  ;;  %v153_v19 = vcombine.high %v532_v17, %v532_v17  ;;  %v159_v16 = vsel %vm60_vm0, %v532_v17, 0.0 }
  0x39   :  { %v337_v20 = vcombine.high %v512_v8, %v512_v8  ;;  %v344_v21 = vrot.slane %v512_v8, %v506_v5  ;;  %v195_v23 = vadd.f32 %v194_v10, %v193_v14  ;;  %v305_v31 = vcombine.high %v508_v6, %v508_v6 }
  0x3a   :  { %268 = vadd.xlane.f32.xlu1 %v267_v2  ;;  %v100_v22 = vadd.f32 %v99_v4, %v98_v11  ;;  %v154_v24 = vcombine.high %v152_v18, %v152_v18  ;;  %v162_v25 = vsel %vm60_vm0, %v152_v18, 0.0  ;;  %v160_v13 = vsel %vm60_vm0, %v153_v19, 0.0 }
  0x3b   :  { %v351_v26 = vrot.slane %v337_v20, %v506_v5  ;;  %v352_v27 = vcombine.high %v344_v21, %v344_v21  ;;  %v358_v28 = vsel %vm60_vm0, %v344_v21, 0.0  ;;  %v197_v17 = vadd.f32 %v196_v15, %v195_v23 }
  0x3c   :  { %101 = vadd.xlane.f32.xlu0 %v100_v22  ;;  %v161_v29 = vadd.f32 %v160_v13, %v159_v16  ;;  %v164_v30 = vsel %vm60_vm0, %v154_v24, 0.0  ;;  %v312_v35 = vrot.slane %v508_v6, %v506_v5  ;;  %v319_v38 = vrot.slane %v305_v31, %v506_v5 }
  0x3d   :  { %v353_v32 = vcombine.high %v351_v26, %v351_v26  ;;  %v359_v33 = vsel %vm60_vm0, %v352_v27, 0.0  ;;  %v361_v34 = vsel %vm60_vm0, %v351_v26, 0.0  ;;  %v271_v39 = vmul.f32 %v512_v8, %v508_v6 }
  0x3e   :  { %198 = vadd.xlane.f32.xlu1 %v197_v17  ;;  %v163_v36 = vadd.f32 %v162_v25, %v161_v29  ;;  %v360_v37 = vadd.f32 %v359_v33, %v358_v28  ;;  %v320_v41 = vcombine.high %v312_v35, %v312_v35  ;;  %v326_v42 = vsel %vm60_vm0, %v312_v35, 0.0 }
  0x3f   :  { %v363_v40 = vsel %vm60_vm0, %v353_v32, 0.0  ;;  %v104_v43 = vmul.f32 %v520_v12, %v510_v7  ;;  %v321_v46 = vcombine.high %v319_v38, %v319_v38  ;;  %v329_v47 = vsel %vm60_vm0, %v319_v38, 0.0 }
  0x40   :  { %v165_v44 = vadd.f32 %v164_v30, %v163_v36  ;;  %v362_v45 = vadd.f32 %v361_v34, %v360_v37  ;;  %v327_v48 = vsel %vm60_vm0, %v320_v41, 0.0  ;;  %v273_v49 = vcombine.high %v271_v39, %v271_v39 }
  0x41   :  { %v280_v50 = vrot.slane %v271_v39, %v506_v5  ;;  %v106_v51 = vcombine.high %v104_v43, %v104_v43  ;;  %v328_v8 = vadd.f32 %v327_v48, %v326_v42  ;;  %v331_v52 = vsel %vm60_vm0, %v321_v46, 0.0 }
  0x42   :  { %166 = vadd.xlane.f32.xlu0 %v165_v44  ;;  %v364_v6 = vadd.f32 %v363_v40, %v362_v45  ;;  %v113_v53 = vrot.slane %v104_v43, %v506_v5  ;;  %v287_v7 = vrot.slane %v273_v49, %v506_v5 }
  0x43   :  { %v288_v12 = vcombine.high %v280_v50, %v280_v50  ;;  %v294_v54 = vsel %vm60_vm0, %v280_v50, 0.0  ;;  %v120_v55 = vrot.slane %v106_v51, %v506_v5  ;;  %v330_v56 = vadd.f32 %v329_v47, %v328_v8 }
  0x44   :  { %365 = vadd.xlane.f32.xlu1 %v364_v6  ;;  %v121_v57 = vcombine.high %v113_v53, %v113_v53  ;;  %v127_v58 = vsel %vm60_vm0, %v113_v53, 0.0  ;;  %v289_v59 = vcombine.high %v287_v7, %v287_v7  ;;  %v297_v61 = vsel %vm60_vm0, %v287_v7, 0.0 }
  0x45   :  { %v295_v60 = vsel %vm60_vm0, %v288_v12, 0.0  ;;  %v122_v62 = vcombine.high %v120_v55, %v120_v55  ;;  %v332_v63 = vadd.f32 %v331_v52, %v330_v56  ;;  %v130_v2 = vsel %vm60_vm0, %v120_v55, 0.0 }
  0x46   :  { %v296_v0 = vadd.f32 %v295_v60, %v294_v54  ;;  %v128_v1 = vsel %vm60_vm0, %v121_v57, 0.0  ;;  %v299_v4 = vsel %vm60_vm0, %v289_v59, 0.0 }
  0x47   :  { %v129_v5 = vadd.f32 %v128_v1, %v127_v58  ;;  %333 = vadd.xlane.f32.xlu0 %v332_v63  ;;  %v132_v10 = vsel %vm60_vm0, %v122_v62, 0.0 }
  0x48   :  { %v298_v9 = vadd.f32 %v297_v61, %v296_v0 }
  0x49   :  { %v131_v11 = vadd.f32 %v130_v2, %v129_v5 }
  0x4a   :  { %v300_v14 = vadd.f32 %v299_v4, %v298_v9 }
  0x4b   :  { %v133_v15 = vadd.f32 %v132_v10, %v131_v11 }
  0x4c   :  { %301 = vadd.xlane.f32.xlu1 %v300_v14 }
  0x4d   :  { %134 = vadd.xlane.f32.xlu0 %v133_v15 }
  0xc3   :  { %v236_v18 = vpop.xlane.xlu1 %235  ;;  %v69_v19 = vpop.xlane.xlu0 %68 }
  0xc4   :  { %v237_v16 = vadd.f32 %v236_v18, %v69_v19 }
  0xc6   :  { %v368_v20 = vmax.f32 %v237_v16, 1e-24 }
  0xc7   :  { %v269_v21 = vpop.xlane.xlu1 %268 }
  0xc8   :  { %409 = vrsqrt.f32 %v368_v20 }
  0xc9   :  { %v102_v22 = vpop.xlane.xlu0 %101 }
  0xca   :  { %v270_v23 = vadd.f32 %v269_v21, %v102_v22 }
  0xcb   :  { %v199_v25 = vpop.xlane.xlu1 %198 }
  0xcc   :  { %v370_v24 = vmax.f32 %v270_v23, 1e-24 }
  0xce   :  { %411 = vrsqrt.f32 %v370_v24 }
  0xcf   :  { %v167_v13 = vpop.xlane.xlu0 %166 }
  0xd1   :  { %v366_v27 = vpop.xlane.xlu1 %365 }
  0xd2   :  { %v410_v26 = vpop.eup %409  ;;  %v367_v30 = vadd.f32 %v366_v27, %v199_v25 }
  0xd3   :  { %v372_v17 = vmul.f32 %v410_v26, %v237_v16 }
  0xd4   :  { %v334_v28 = vpop.xlane.xlu0 %333 }
  0xd5   :  { %v335_v29 = vadd.f32 %v334_v28, %v167_v13  ;;  %v373_v37 = vmul.f32 %v410_v26, %v372_v17 }
  0xd7   :  { %v381_v34 = vmul.f32 %v410_v26, %v335_v29 }
  0xd8   :  { %v412_v31 = vpop.eup %411 }
  0xd9   :  { %v374_v32 = vmul.f32 %v412_v31, %v270_v23  ;;  %v382_v33 = vmul.f32 %v412_v31, %v367_v30  ;;  %v302_v35 = vpop.xlane.xlu1 %301  ;;  %v377_v36 = vmul.f32 %v412_v31, %v410_v26 }
  0xda   :  { %v135_v38 = vpop.xlane.xlu0 %134 }
  0xdb   :  { %v375_v39 = vmul.f32 %v412_v31, %v374_v32  ;;  %v383_v40 = vsub.f32 %v381_v34, %v382_v33  ;;  %v378_v41 = vmul.f32 2.0, %v377_v36  ;;  %v303_v42 = vadd.f32 %v302_v35, %v135_v38 }
  0xdd   :  { %v376_v43 = vadd.f32 %v375_v39, %v373_v37  ;;  %v379_v44 = vmul.f32 %v378_v41, %v303_v42  ;;  %v384_v45 = vmul.f32 2e-06, %v383_v40 }
  0xdf   :  { %v380_v46 = vsub.f32 %v376_v43, %v379_v44 }
  0xe1   :  { %v385_v47 = vadd.f32 %v384_v45, %v380_v46 }
  0xe3   :  { %v386_v48 = vadd.f32 1.024e-09, %v385_v47 }
  0xe5   :  { %v393_v49 = vsel %vm392_vm1, %v386_v48, 0.0 }
  0xe6   :  { %395 = vst.msk [vmem:[%s611_s2] sm:$0x3] %vm394_vm2, %v393_v49 }
  0xe7   :  { %400 = vsyncpa [#allocation3], 1 }
  0xe8   :  { %401 = vsyncpa [#allocation5], 1 }

</bundles_post_ra>
